<compile_context>
chip_gen: v7x
topology: tpu7x:2x2x1
jax: 0.10.0
libtpu: 0.0.40
codegen_flags: <defaults>
</compile_context>

<pallas_src>
import jax
import jax.numpy as jnp
from jax.experimental import pallas as pl
from jax.experimental.pallas import tpu as pltpu


def cca_kernel(x_ref, w1t_ref, b1_ref, w2t_ref, b2_ref, o_ref):
    # x_ref block: (bB, C, HW) -- C on sublanes, HW on lanes.
    xb = x_ref[...]                                   # native dtype, read once
    hw = xb.shape[-1]
    inv_hw = 1.0 / hw

    # One fused reduction pass: sum and sum-of-squares together.
    xf = xb.astype(jnp.float32)                       # no-op for f32 inputs
    s1 = jnp.sum(xf, axis=-1)                         # (bB, C)  lane-major
    s2 = jnp.sum(xf * xf, axis=-1)                    # (bB, C)
    mean = s1 * inv_hw
    var = jnp.maximum(s2 * inv_hw - mean * mean, 0.0)  # clamp cancellation
    y = jnp.sqrt(var) + mean                          # stdv_channels + avg_pool

    # conv_du: 1x1 conv -> LeakyReLU(0.1) -> 1x1 conv -> Sigmoid, batched over bB.
    h = jnp.dot(y, w1t_ref[...], preferred_element_type=jnp.float32) + b1_ref[...]
    h = jnp.where(h >= 0.0, h, 0.1 * h)
    s = jax.nn.sigmoid(
        jnp.dot(h, w2t_ref[...], preferred_element_type=jnp.float32) + b2_ref[...]
    )                                                  # (bB, C)

    # x * y: broadcast the per-(sample, channel) gate over the spatial lanes.
    # Gate is cast to x's dtype so the full-tile multiply stays in input dtype.
    o_ref[...] = (xb * s[:, :, None].astype(xb.dtype)).astype(o_ref.dtype)


def _largest_divisor_leq(n, cap):
    cap = max(1, min(n, cap))
    for d in range(cap, 0, -1):
        if n % d == 0:
            return d
    return 1


def cca_layer(x, w1, b1, w2, b2, *, vmem_block_budget_bytes=24 * 1024 * 1024):
    """x: (B, C, H, W); w1: (mid, C); b1: (mid,); w2: (C, mid); b2: (C,)."""
    B, C, H, W = x.shape
    HW = H * W
    mid = w1.shape[0]

    x3 = x.reshape(B, C, HW)
    w1t = jnp.transpose(w1)        # (C, mid)   pre-transposed once, outside kernel
    w2t = jnp.transpose(w2)        # (mid, C)
    b1r = b1.reshape(1, mid)       # lane-dense biases
    b2r = b2.reshape(1, C)

    # Pack as many batch samples per grid step as the VMEM budget allows
    # (in + out, double-buffered => ~4x block bytes resident).
    per_sample = C * HW * x.dtype.itemsize
    bB_cap = max(1, vmem_block_budget_bytes // (4 * per_sample))
    bB = _largest_divisor_leq(B, bB_cap)
    grid_b = B // bB

    # TODO(synk): for very large C*H*W (single sample approaching the v7x 64 MiB
    # VMEM), add a two-pass spatially-tiled variant (reduce pass + scale pass)
    # and make the spatial tile the "parallel" axis; not needed at these shapes.
    weight_bytes = (w1t.size + w2t.size + b1r.size + b2r.size) * 4
    needed = 4 * bB * per_sample + weight_bytes + (1 << 20)
    vmem_limit = int(min(max(needed, 32 << 20), 64 << 20))

    out = pl.pallas_call(
        cca_kernel,
        out_shape=jax.ShapeDtypeStruct((B, C, HW), x.dtype),
        grid_spec=pltpu.PrefetchScalarGridSpec(
            num_scalar_prefetch=0,
            grid=(grid_b,),
            in_specs=[
                pl.BlockSpec((bB, C, HW), lambda i: (i, 0, 0)),  # x slab
                pl.BlockSpec((C, mid), lambda i: (0, 0)),        # conv1 weight^T
                pl.BlockSpec((1, mid), lambda i: (0, 0)),        # conv1 bias
                pl.BlockSpec((mid, C), lambda i: (0, 0)),        # conv2 weight^T
                pl.BlockSpec((1, C), lambda i: (0, 0)),          # conv2 bias
            ],
            out_specs=pl.BlockSpec((bB, C, HW), lambda i: (i, 0, 0)),
        ),
        compiler_params=pltpu.CompilerParams(
            dimension_semantics=("parallel",),
            vmem_limit_bytes=vmem_limit,
        ),
    )(x3, w1t, b1r, w2t, b2r)
    return out.reshape(B, C, H, W)


def cca_ref(x, w1, b1, w2, b2):
    """Pure-JAX reference mirroring the PyTorch forward."""
    xf = x.astype(jnp.float32)
    mean = xf.mean(axis=(2, 3), keepdims=True)
    var = ((xf - mean) ** 2).mean(axis=(2, 3), keepdims=True)
    std = jnp.sqrt(var)
    y = (std + mean)[:, :, 0, 0]                      # (B, C)
    h = y @ w1.T + b1                                 # (B, mid)
    h = jnp.where(h >= 0, h, 0.1 * h)
    s = jax.nn.sigmoid(h @ w2.T + b2)                 # (B, C)
    return xf * s[:, :, None, None]


if __name__ == "__main__":
    B, C, H, W = 2, 32, 16, 16
    reduction = 16
    mid = C // reduction

    key = jax.random.PRNGKey(0)
    kx, k1, k2, k3, k4 = jax.random.split(key, 5)

    x = jax.random.normal(kx, (B, C, H, W), dtype=jnp.float32)
    # Conv2d(C, mid, 1) weight (mid, C, 1, 1) -> (mid, C); Conv2d(mid, C, 1) -> (C, mid)
    w1 = jax.random.normal(k1, (mid, C), dtype=jnp.float32) * (1.0 / jnp.sqrt(C))
    b1 = jax.random.normal(k2, (mid,), dtype=jnp.float32) * 0.1
    w2 = jax.random.normal(k3, (C, mid), dtype=jnp.float32) * (1.0 / jnp.sqrt(mid))
    b2 = jax.random.normal(k4, (C,), dtype=jnp.float32) * 0.1

    out = cca_layer(x, w1, b1, w2, b2)
    out = jax.block_until_ready(out)

    ref = cca_ref(x, w1, b1, w2, b2)
    assert out.shape == (B, C, H, W)
    assert jnp.allclose(out, ref, atol=2e-5, rtol=2e-5), "mismatch vs reference"

    print("KERNEL_OK")
</pallas_src>

<mosaic_0001>
module attributes {stable_mosaic.version = 11 : i64} {
  func.func @cca_kernel(%arg0: i32, %arg1: memref<2x32x256xf32, #tpu.memory_space<vmem>>, %arg2: memref<32x2xf32, #tpu.memory_space<vmem>>, %arg3: memref<1x2xf32, #tpu.memory_space<vmem>>, %arg4: memref<2x32xf32, #tpu.memory_space<vmem>>, %arg5: memref<1x32xf32, #tpu.memory_space<vmem>>, %arg6: memref<2x32x256xf32, #tpu.memory_space<vmem>>) attributes {dimension_semantics = [#tpu.dimension_semantics<parallel>], iteration_bounds = array<i64: 1>, scalar_prefetch = 0 : i64, scratch_operands = 0 : i64, tpu.core_type = #tpu.core_type<tc>, window_params = [{transform_indices = @transform_0, window_bounds = array<i64: 2, 32, 256>}, {pipeline_mode = #tpu.pipeline_mode<synchronous>, transform_indices = @transform_1, window_bounds = array<i64: 32, 2>}, {pipeline_mode = #tpu.pipeline_mode<synchronous>, transform_indices = @transform_2, window_bounds = array<i64: 1, 2>}, {pipeline_mode = #tpu.pipeline_mode<synchronous>, transform_indices = @transform_3, window_bounds = array<i64: 2, 32>}, {pipeline_mode = #tpu.pipeline_mode<synchronous>, transform_indices = @transform_4, window_bounds = array<i64: 1, 32>}, {transform_indices = @transform_5, window_bounds = array<i64: 2, 32, 256>}]} {
    %c0 = arith.constant 0 : index
    %c0_0 = arith.constant 0 : index
    %c0_1 = arith.constant 0 : index
    %0 = vector.load %arg1[%c0, %c0_0, %c0_1] : memref<2x32x256xf32, #tpu.memory_space<vmem>>, vector<2x32x256xf32>
    %cst = arith.constant dense<0.000000e+00> : vector<2x32xf32>
    %1 = vector.multi_reduction <add>, %0, %cst [2] : vector<2x32x256xf32> to vector<2x32xf32>
    %2 = arith.mulf %0, %0 : vector<2x32x256xf32>
    %cst_2 = arith.constant dense<0.000000e+00> : vector<2x32xf32>
    %3 = vector.multi_reduction <add>, %2, %cst_2 [2] : vector<2x32x256xf32> to vector<2x32xf32>
    %cst_3 = arith.constant 3.906250e-03 : f32
    %4 = vector.broadcast %cst_3 : f32 to vector<2x32xf32>
    %5 = arith.mulf %1, %4 : vector<2x32xf32>
    %cst_4 = arith.constant 3.906250e-03 : f32
    %6 = vector.broadcast %cst_4 : f32 to vector<2x32xf32>
    %7 = arith.mulf %3, %6 : vector<2x32xf32>
    %8 = arith.mulf %5, %5 : vector<2x32xf32>
    %9 = arith.subf %7, %8 : vector<2x32xf32>
    %cst_5 = arith.constant 0.000000e+00 : f32
    %10 = vector.broadcast %cst_5 : f32 to vector<2x32xf32>
    %11 = arith.maximumf %9, %10 : vector<2x32xf32>
    %12 = math.sqrt %11 : vector<2x32xf32>
    %13 = arith.addf %12, %5 : vector<2x32xf32>
    %c0_6 = arith.constant 0 : index
    %c0_7 = arith.constant 0 : index
    %14 = vector.load %arg2[%c0_6, %c0_7] : memref<32x2xf32, #tpu.memory_space<vmem>>, vector<32x2xf32>
    %cst_8 = arith.constant dense<0.000000e+00> : vector<2x2xf32>
    %15 = tpu.matmul %13, %14, %cst_8 {dimension_numbers = #tpu.dot_dimension_numbers<[1], [0], [0], [1], [0, 0, 1, 1], [], []>} : vector<2x32xf32>, vector<32x2xf32>, vector<2x2xf32> -> vector<2x2xf32>
    %c0_9 = arith.constant 0 : index
    %c0_10 = arith.constant 0 : index
    %16 = vector.load %arg3[%c0_9, %c0_10] : memref<1x2xf32, #tpu.memory_space<vmem>>, vector<1x2xf32>
    %17 = vector.broadcast %16 : vector<1x2xf32> to vector<2x2xf32>
    %18 = arith.addf %15, %17 : vector<2x2xf32>
    %cst_11 = arith.constant 0.000000e+00 : f32
    %19 = vector.broadcast %cst_11 : f32 to vector<2x2xf32>
    %20 = arith.cmpf oge, %18, %19 : vector<2x2xf32>
    %cst_12 = arith.constant 1.000000e-01 : f32
    %21 = vector.broadcast %cst_12 : f32 to vector<2x2xf32>
    %22 = arith.mulf %21, %18 : vector<2x2xf32>
    %23 = arith.select %20, %18, %22 : vector<2x2xi1>, vector<2x2xf32>
    %c0_13 = arith.constant 0 : index
    %c0_14 = arith.constant 0 : index
    %24 = vector.load %arg4[%c0_13, %c0_14] : memref<2x32xf32, #tpu.memory_space<vmem>>, vector<2x32xf32>
    %cst_15 = arith.constant dense<0.000000e+00> : vector<2x32xf32>
    %25 = tpu.matmul %23, %24, %cst_15 {dimension_numbers = #tpu.dot_dimension_numbers<[1], [0], [0], [1], [0, 0, 1, 1], [], []>} : vector<2x2xf32>, vector<2x32xf32>, vector<2x32xf32> -> vector<2x32xf32>
    %c0_16 = arith.constant 0 : index
    %c0_17 = arith.constant 0 : index
    %26 = vector.load %arg5[%c0_16, %c0_17] : memref<1x32xf32, #tpu.memory_space<vmem>>, vector<1x32xf32>
    %27 = vector.broadcast %26 : vector<1x32xf32> to vector<2x32xf32>
    %28 = arith.addf %25, %27 : vector<2x32xf32>
    %29 = arith.negf %28 : vector<2x32xf32>
    %30 = math.exp %29 : vector<2x32xf32>
    %cst_18 = arith.constant 1.000000e+00 : f32
    %31 = vector.broadcast %cst_18 : f32 to vector<2x32xf32>
    %32 = arith.addf %31, %30 : vector<2x32xf32>
    %33 = arith.divf %31, %32 : vector<2x32xf32>
    %34 = vector.shape_cast %33 : vector<2x32xf32> to vector<2x32x1xf32>
    %35 = vector.broadcast %34 : vector<2x32x1xf32> to vector<2x32x256xf32>
    %36 = arith.mulf %0, %35 : vector<2x32x256xf32>
    %c0_19 = arith.constant 0 : index
    %c0_20 = arith.constant 0 : index
    %c0_21 = arith.constant 0 : index
    %37 = vector.load %arg6[%c0_19, %c0_20, %c0_21] : memref<2x32x256xf32, #tpu.memory_space<vmem>>, vector<2x32x256xf32>
    tpu.vector_store %arg6[%c0_19, %c0_20, %c0_21], %36 {strides = array<i32>} : memref<2x32x256xf32, #tpu.memory_space<vmem>>, vector<2x32x256xf32>,
    return
  }
  func.func @transform_0(%arg0: i32) -> (i32, i32, i32) {
    %c0_i32 = arith.constant 0 : i32
    %c0_i32_0 = arith.constant 0 : i32
    %c0_i32_1 = arith.constant 0 : i32
    return %arg0, %c0_i32, %c0_i32_0 : i32, i32, i32
  }
  func.func @transform_1(%arg0: i32) -> (i32, i32) {
    %c0_i32 = arith.constant 0 : i32
    %c0_i32_0 = arith.constant 0 : i32
    %c0_i32_1 = arith.constant 0 : i32
    return %c0_i32, %c0_i32_0 : i32, i32
  }
  func.func @transform_2(%arg0: i32) -> (i32, i32) {
    %c0_i32 = arith.constant 0 : i32
    %c0_i32_0 = arith.constant 0 : i32
    %c0_i32_1 = arith.constant 0 : i32
    return %c0_i32, %c0_i32_0 : i32, i32
  }
  func.func @transform_3(%arg0: i32) -> (i32, i32) {
    %c0_i32 = arith.constant 0 : i32
    %c0_i32_0 = arith.constant 0 : i32
    %c0_i32_1 = arith.constant 0 : i32
    return %c0_i32, %c0_i32_0 : i32, i32
  }
  func.func @transform_4(%arg0: i32) -> (i32, i32) {
    %c0_i32 = arith.constant 0 : i32
    %c0_i32_0 = arith.constant 0 : i32
    %c0_i32_1 = arith.constant 0 : i32
    return %c0_i32, %c0_i32_0 : i32, i32
  }
  func.func @transform_5(%arg0: i32) -> (i32, i32, i32) {
    %c0_i32 = arith.constant 0 : i32
    %c0_i32_0 = arith.constant 0 : i32
    %c0_i32_1 = arith.constant 0 : i32
    return %arg0, %c0_i32, %c0_i32_0 : i32, i32, i32
  }
}

</mosaic_0001>

<bundles_post_ra>
// kernel: tpu_custom_call.1
= control target key start
LH: loop header
LB: loop body
LE: loop exit
PB: predicated region body
PF: predicated region fallthrough
CT: control target
= control target key end

     0   :  { %10 = vsyncpa [#allocation3], 0  ;;  %s983_s0 = inlined_call_operand.hbm [shape: f32[2,32,256], index: 0, kind: input, shape index: {}]   ;;  %s984_s1 = inlined_call_operand.vmem [shape: f32[32,2], index: 1, kind: input, shape index: {}]   ;;  %s985_s2 = inlined_call_operand.vmem [shape: f32[1,2], index: 2, kind: input, shape index: {}]   ;;  %s986_s3 = inlined_call_operand.vmem [shape: f32[2,32], index: 3, kind: input, shape index: {}]   ;;  %s987_s4 = inlined_call_operand.vmem [shape: f32[1,32], index: 4, kind: input, shape index: {}]   ;;  %s988_s5 = inlined_call_operand.hbm [shape: f32[2,32,256], index: 5, kind: output, shape index: {}]  }
   0x1   :  { %11 = vsyncpa [#allocation4], 0  ;;  %s651_s18 = smov [#allocation2]   ;;  %s603_s22 = scalar_lea.hbm %s983_s0, 2048 }
   0x2   :  { %s17_s19 = sshll.u32 %s651_s18, 4  ;;  %p604_p0 = scmp.ne.s32.totalorder %s983_s0, %s603_s22  ;;  %s18_s19 = int_to_ptr.vmem [resolvable:$true] %s17_s19 }
   0x3   :  { %p607_p1 = scmp.lt.u32.totalorder %s603_s22, %s983_s0 }
   0x5   :  { %p609_p2 = pnand %p607_p1, %p604_p0 }
   0x7   :  { %612 = shalt.err (!%p609_p2)
}
   0x8   :  { %s613_s27 = scalar_lea.vmem %s18_s19, 2048  ;;  %p618_p4 = scmp.lt.s32.totalorder %s18_s19, %s18_s19 }
   0x9   :  { %p614_p3 = scmp.ne.s32.totalorder %s18_s19, %s613_s27  ;;  %p619_p5 = scmp.lt.s32.totalorder %s613_s27, %s613_s27 }
   0xb   :  { %p620_p6 = por %p619_p5, %p618_p4 }
   0xd   :  { %p621_p7 = pnand %p620_p6, %p614_p3 }
   0xf   :  { %624 = shalt.err (!%p621_p7)
}
  0x10   :  { %s652_s28 = smov 256   ;;  %s653_s29 = smov 16  }
  0x11   :  { %23 = dma.hbm_to_vmem [thread:$0]  %s983_s0, 2048, %s18_s19, [#allocation3], %s652_s28, %s652_s28, %s653_s29  }
  0x12   :  { %647 = dma.done.wait [#allocation3], 2048  }
  0x13   :  { %648 = vsyncadd [#allocation3], 4294965248  ;;  %v703_v0 = vld [vmem:[#allocation2 + $0x40] sm:$0xff]  ;;  %v705_v1 = vld [vmem:[#allocation2 + $0x48] sm:$0xff]  ;;  %v654_v51 = vmov 0.0|0.0   ;;  %vm655_vm0 = vmmov 0  }
  0x14   :  { %v707_v2 = vld [vmem:[#allocation2] sm:$0xff]  ;;  %v63_v3 = vadd.f32 %v705_v1, %v703_v0  ;;  %v711_v4 = vld [vmem:[#allocation2 + $0x8] sm:$0xff]  ;;  %v713_v5 = vld [vmem:[#allocation2 + $0x50] sm:$0xff]  ;;  %v83_v32 = vmul.f32 %v703_v0, %v703_v0  ;;  %v84_v33 = vmul.f32 %v705_v1, %v705_v1  ;;  %570 = vmatprep.subr.bf16.mxu0 %v654_v51  ;;  %v656_v54 = vmov 0.0  }
  0x15   :  { %v715_v6 = vld [vmem:[#allocation2 + $0x58] sm:$0xff]  ;;  %v51_v7 = vadd.f32 %v711_v4, %v707_v2  ;;  %v719_v8 = vld [vmem:[#allocation2 + $0x10] sm:$0xff]  ;;  %v727_v12 = vld [vmem:[#allocation2 + $0x60] sm:$0xff]  ;;  %v75_v26 = vmul.f32 %v707_v2, %v707_v2  ;;  %v76_v27 = vmul.f32 %v711_v4, %v711_v4  ;;  %v85_v29 = vmul.f32 %v713_v5, %v713_v5  ;;  %562 = vmatprep.mubr.msk.f32.mxu0 %vm655_vm0, %v656_v54 }
  0x16   :  { %v721_v9 = vld [vmem:[#allocation2 + $0x18] sm:$0xff]  ;;  %64 = vadd.xlane.f32.xlu1 %v63_v3  ;;  %v66_v10 = vadd.f32 %v715_v6, %v713_v5  ;;  %v729_v13 = vld [vmem:[#allocation2 + $0x68] sm:$0xff]  ;;  %v731_v14 = vld [vmem:[#allocation2 + $0x20] sm:$0xff]  ;;  %v77_v23 = vmul.f32 %v719_v8, %v719_v8  ;;  %v86_v30 = vmul.f32 %v715_v6, %v715_v6  ;;  %v87_v35 = vmul.f32 %v727_v12, %v727_v12 }
  0x17   :  { %52 = vadd.xlane.f32.xlu0 %v51_v7  ;;  %v54_v11 = vadd.f32 %v721_v9, %v719_v8  ;;  %v733_v15 = vld [vmem:[#allocation2 + $0x28] sm:$0xff]  ;;  %v69_v16 = vadd.f32 %v729_v13, %v727_v12  ;;  %v739_v18 = vld [vmem:[#allocation2 + $0x70] sm:$0xff]  ;;  %v741_v19 = vld [vmem:[#allocation2 + $0x78] sm:$0xff]  ;;  %v78_v24 = vmul.f32 %v721_v9, %v721_v9  ;;  %v91_v31 = vadd.f32 %v76_v27, %v75_v26 }
  0x18   :  { %v57_v17 = vadd.f32 %v733_v15, %v731_v14  ;;  %v743_v20 = vld [vmem:[#allocation2 + $0x30] sm:$0xff]  ;;  %v745_v21 = vld [vmem:[#allocation2 + $0x38] sm:$0xff]  ;;  %v72_v22 = vadd.f32 %v741_v19, %v739_v18  ;;  %v106_v34 = vadd.f32 %v86_v30, %v85_v29  ;;  %v88_v36 = vmul.f32 %v729_v13, %v729_v13  ;;  %v219_v48 = vld [vmem:[%s984_s1] sm:$0xff]  ;;  %565 = vmatprep.subr.mxu1 %v656_v54 }
  0x19   :  { %v60_v25 = vadd.f32 %v745_v21, %v743_v20  ;;  %v94_v28 = vadd.f32 %v78_v24, %v77_v23  ;;  %v103_v37 = vadd.f32 %v84_v33, %v83_v32  ;;  %v79_v38 = vmul.f32 %v731_v14, %v731_v14  ;;  %v220_v49 = vld [vmem:[%s984_s1 + $0x8] sm:$0xff]  ;;  %v221_v50 = vld [vmem:[%s984_s1 + $0x10] sm:$0xff]  ;;  %v222_v53 = vld [vmem:[%s984_s1 + $0x18] sm:$0xff]  ;;  %567 = vmatprep.mubr.msk.f32.mxu1 %vm655_vm0, %v656_v54 }
  0x1a   :  { %67 = vadd.xlane.f32.xlu1 %v66_v10  ;;  %v80_v39 = vmul.f32 %v733_v15, %v733_v15  ;;  %v109_v40 = vadd.f32 %v88_v36, %v87_v35  ;;  %v89_v41 = vmul.f32 %v739_v18, %v739_v18  ;;  %v90_v42 = vmul.f32 %v741_v19, %v741_v19 }
  0x1b   :  { %55 = vadd.xlane.f32.xlu0 %v54_v11  ;;  %v81_v44 = vmul.f32 %v743_v20, %v743_v20  ;;  %v82_v45 = vmul.f32 %v745_v21, %v745_v21  ;;  %v571_v52 = vpack.c.bf16 %v220_v49, %v219_v48  ;;  %v574_v55 = vpack.c.bf16 %v222_v53, %v221_v50 }
  0x1c   :  { %v97_v43 = vadd.f32 %v80_v39, %v79_v38  ;;  %v112_v46 = vadd.f32 %v90_v42, %v89_v41  ;;  %v238_v29 = vlaneseq  ;;  %vm249_vm13 = vcmask 130112  }
  0x1d   :  { %v100_v47 = vadd.f32 %v82_v45, %v81_v44  ;;  %572 = vmatpush3.bf16.msra.mxu0 %v571_v52 }
  0x1e   :  { %70 = vadd.xlane.f32.xlu1 %v69_v16  ;;  %573 = vmatprep.subr.bf16.mxu0 %v654_v51  ;;  %v239_v42 = vand.u32 127, %v238_v29 }
  0x1f   :  { %58 = vadd.xlane.f32.xlu0 %v57_v17 }
  0x21   :  { %575 = vmatpush3.bf16.msra.mxu0 %v574_v55  ;;  %v835_v55 = vshrl.u32 %v238_v29, 7 }
  0x22   :  { %73 = vadd.xlane.f32.xlu1 %v72_v22 }
  0x23   :  { %61 = vadd.xlane.f32.xlu0 %v60_v25 }
  0x26   :  { %95 = vadd.xlane.f32.xlu1 %v94_v28 }
  0x27   :  { %92 = vadd.xlane.f32.xlu0 %v91_v31 }
  0x2a   :  { %107 = vadd.xlane.f32.xlu1 %v106_v34 }
  0x2b   :  { %104 = vadd.xlane.f32.xlu0 %v103_v37 }
  0x2e   :  { %110 = vadd.xlane.f32.xlu1 %v109_v40 }
  0x2f   :  { %98 = vadd.xlane.f32.xlu0 %v97_v43 }
  0x32   :  { %113 = vadd.xlane.f32.xlu1 %v112_v46 }
  0x33   :  { %101 = vadd.xlane.f32.xlu0 %v100_v47 }
  0xa3   :  { %v65_v56 = vpop.xlane.xlu1 %64 }
  0xa4   :  { %v53_v57 = vpop.xlane.xlu0 %52  ;;  %v803_v23 = vmul.f32 0.00390625, %v65_v56 }
  0xa5   :  { %v797_v7 = vmul.f32 0.00390625, %v53_v57 }
  0xa6   :  { %v135_v35 = vmul.f32 %v803_v23, %v803_v23 }
  0xa7   :  { %v68_v58 = vpop.xlane.xlu1 %67  ;;  %v131_v24 = vmul.f32 %v797_v7, %v797_v7 }
  0xa8   :  { %v56_v59 = vpop.xlane.xlu0 %55  ;;  %v799_v11 = vmul.f32 0.00390625, %v68_v58 }
  0xa9   :  { %v795_v63 = vmul.f32 0.00390625, %v56_v59 }
  0xaa   :  { %v136_v30 = vmul.f32 %v799_v11, %v799_v11 }
  0xab   :  { %v71_v60 = vpop.xlane.xlu1 %70  ;;  %v132_v16 = vmul.f32 %v795_v63, %v795_v63 }
  0xac   :  { %v59_v61 = vpop.xlane.xlu0 %58  ;;  %v809_v31 = vmul.f32 0.00390625, %v71_v60  ;;  %v244_v60 = vadd.s32 4294967288, %v239_v42 }
  0xad   :  { %v815_v36 = vmul.f32 0.00390625, %v59_v61 }
  0xae   :  { %v137_v43 = vmul.f32 %v809_v31, %v809_v31 }
  0xaf   :  { %v74_v62 = vpop.xlane.xlu1 %73  ;;  %v133_v48 = vmul.f32 %v815_v36, %v815_v36 }
  0xb0   :  { %v62_v3 = vpop.xlane.xlu0 %61  ;;  %v823_v44 = vmul.f32 0.00390625, %v74_v62 }
  0xb1   :  { %v829_v49 = vmul.f32 0.00390625, %v62_v3 }
  0xb2   :  { %v138_v56 = vmul.f32 %v823_v44, %v823_v44 }
  0xb3   :  { %v96_v10 = vpop.xlane.xlu1 %95  ;;  %v134_v61 = vmul.f32 %v829_v49, %v829_v49 }
  0xb4   :  { %v124_v17 = vmul.f32 0.00390625, %v96_v10  ;;  %v93_v22 = vpop.xlane.xlu0 %92  ;;  %v251_v10 = vadd.s32 4294967280, %v239_v42 }
  0xb5   :  { %v123_v25 = vmul.f32 0.00390625, %v93_v22 }
  0xb6   :  { %v140_v26 = vsub.f32 %v124_v17, %v132_v16  ;;  %v258_v17 = vadd.s32 4294967272, %v239_v42 }
  0xb7   :  { %v139_v27 = vsub.f32 %v123_v25, %v131_v24  ;;  %v108_v28 = vpop.xlane.xlu1 %107 }
  0xb8   :  { %v811_v32 = vmax.f32 %v140_v26, 0.0  ;;  %v128_v33 = vmul.f32 0.00390625, %v108_v28  ;;  %v105_v34 = vpop.xlane.xlu0 %104  ;;  %v850_v26 = vsub.s32 %v239_v42, %v835_v55 }
  0xb9   :  { %v817_v37 = vmax.f32 %v139_v27, 0.0  ;;  %v127_v38 = vmul.f32 0.00390625, %v105_v34 }
  0xba   :  { %583 = vrsqrt.f32 %v811_v32  ;;  %v144_v39 = vsub.f32 %v128_v33, %v136_v30  ;;  %v856_v30 = vsub.s32 %v244_v60, %v835_v55  ;;  %v859_v33 = vsub.s32 %v251_v10, %v835_v55 }
  0xbb   :  { %585 = vrsqrt.f32 %v817_v37  ;;  %v143_v40 = vsub.f32 %v127_v38, %v135_v35  ;;  %v111_v41 = vpop.xlane.xlu1 %110  ;;  %vm164_vm1 = vcmp.eq.f32.partialorder %v811_v32, inf  ;;  %v865_v35 = vsub.s32 %v258_v17, %v835_v55 }
  0xbc   :  { %v825_v45 = vmax.f32 %v144_v39, 0.0  ;;  %v129_v46 = vmul.f32 0.00390625, %v111_v41  ;;  %v99_v47 = vpop.xlane.xlu0 %98  ;;  %v167_v38 = vand.u32 2147483648, %v811_v32  ;;  %vm157_vm2 = vcmp.eq.f32.partialorder %v817_v37, inf }
  0xbd   :  { %v831_v50 = vmax.f32 %v143_v40, 0.0  ;;  %v125_v51 = vmul.f32 0.00390625, %v99_v47  ;;  %v160_v39 = vand.u32 2147483648, %v817_v37  ;;  %vm159_vm4 = vcmp.eq.f32.partialorder %v817_v37, 0.0 }
  0xbe   :  { %587 = vrsqrt.f32 %v825_v45  ;;  %v145_v52 = vsub.f32 %v129_v46, %v137_v43  ;;  %vm192_vm3 = vcmp.eq.f32.partialorder %v825_v45, inf  ;;  %v195_v41 = vand.u32 2147483648, %v825_v45 }
  0xbf   :  { %589 = vrsqrt.f32 %v831_v50  ;;  %v141_v53 = vsub.f32 %v125_v51, %v133_v48  ;;  %v114_v54 = vpop.xlane.xlu1 %113  ;;  %vm166_vm5 = vcmp.eq.f32.partialorder %v811_v32, 0.0  ;;  %vm185_vm6 = vcmp.eq.f32.partialorder %v831_v50, inf }
  0xc0   :  { %v839_v57 = vmax.f32 %v145_v52, 0.0  ;;  %v130_v58 = vmul.f32 0.00390625, %v114_v54  ;;  %v102_v59 = vpop.xlane.xlu0 %101  ;;  %v188_v46 = vand.u32 2147483648, %v831_v50  ;;  %vm187_vm7 = vcmp.eq.f32.partialorder %v831_v50, 0.0 }
  0xc1   :  { %v843_v62 = vmax.f32 %v141_v53, 0.0  ;;  %v126_v3 = vmul.f32 0.00390625, %v102_v59  ;;  %vm194_vm8 = vcmp.eq.f32.partialorder %v825_v45, 0.0 }
  0xc2   :  { %591 = vrsqrt.f32 %v839_v57  ;;  %v146_v16 = vsub.f32 %v130_v58, %v138_v56  ;;  %vm199_vm10 = vcmp.eq.f32.partialorder %v839_v57, inf  ;;  %vm201_vm11 = vcmp.eq.f32.partialorder %v839_v57, 0.0 }
  0xc3   :  { %593 = vrsqrt.f32 %v843_v62  ;;  %v142_v22 = vsub.f32 %v126_v3, %v134_v61  ;;  %vm171_vm9 = vcmp.eq.f32.partialorder %v843_v62, inf  ;;  %vm173_vm12 = vcmp.eq.f32.partialorder %v843_v62, 0.0 }
  0xc4   :  { %v584_v24 = vpop.eup %583  ;;  %v847_v25 = vmax.f32 %v146_v16, 0.0  ;;  %v174_v61 = vand.u32 2147483648, %v843_v62  ;;  %v202_v10 = vand.u32 2147483648, %v839_v57 }
  0xc5   :  { %v586_v27 = vpop.eup %585  ;;  %v163_v28 = vmul.f32 %v584_v24, %v811_v32  ;;  %v853_v29 = vmax.f32 %v142_v22, 0.0 }
  0xc6   :  { %v156_v34 = vmul.f32 %v586_v27, %v817_v37  ;;  %595 = vrsqrt.f32 %v847_v25  ;;  %vm206_vm14 = vcmp.eq.f32.partialorder %v847_v25, inf  ;;  %vm208_vm15 = vcmp.eq.f32.partialorder %v847_v25, 0.0 }
  0xc7   :  { %597 = vrsqrt.f32 %v853_v29  ;;  %v165_v47 = vsel %vm164_vm1, %v811_v32, %v163_v28  ;;  %vm178_vm0 = vcmp.eq.f32.partialorder %v853_v29, inf  ;;  %vm180_vm1 = vcmp.eq.f32.partialorder %v853_v29, 0.0 }
  0xc8   :  { %v588_v40 = vpop.eup %587  ;;  %v158_v51 = vsel %vm157_vm2, %v817_v37, %v156_v34  ;;  %v168_v54 = vsel %vm166_vm5, %v167_v38, %v165_v47  ;;  %vm256_vm2 = vcmask 195712   ;;  %vm286_vm5 = vcmask 261120  }
  0xc9   :  { %v590_v42 = vpop.eup %589  ;;  %v191_v43 = vmul.f32 %v588_v40, %v825_v45  ;;  %v161_v60 = vsel %vm159_vm4, %v160_v39, %v158_v51  ;;  %v212_v16 = vadd.f32 %v168_v54, %v795_v63  ;;  %v181_v39 = vand.u32 2147483648, %v853_v29 }
  0xca   :  { %v184_v48 = vmul.f32 %v590_v42, %v831_v50  ;;  %v211_v28 = vadd.f32 %v161_v60, %v797_v7  ;;  %v209_v40 = vand.u32 2147483648, %v847_v25  ;;  %vm284_vm4 = vcmask 1041409  }
  0xcb   :  { %v193_v52 = vsel %vm192_vm3, %v825_v45, %v191_v43  ;;  %vm263_vm3 = vcmask 261312  }
  0xcc   :  { %v592_v53 = vpop.eup %591  ;;  %v186_v32 = vsel %vm185_vm6, %v831_v50, %v184_v48  ;;  %v196_v56 = vsel %vm194_vm8, %v195_v41, %v193_v52  ;;  %vm374_vm6 = vcmask 1041408   ;;  %vm370_vm8 = vcmask 15360  }
  0xcd   :  { %v594_v58 = vpop.eup %593  ;;  %v198_v59 = vmul.f32 %v592_v53, %v839_v57  ;;  %v189_v45 = vsel %vm187_vm7, %v188_v46, %v186_v32  ;;  %v216_v17 = vadd.f32 %v196_v56, %v799_v11  ;;  %v243_v46 = vrot.slane %v211_v28, %v850_v26 }
  0xce   :  { %v170_v3 = vmul.f32 %v594_v58, %v843_v62  ;;  %v215_v37 = vadd.f32 %v189_v45, %v803_v23  ;;  %v543_v45 = vld [vmem:[%s987_s4] ss:$0 sm:$0xff]  ;;  %v475_v28 = vsub.s32 1, %v835_v55 }
  0xcf   :  { %v200_v50 = vsel %vm199_vm10, %v839_v57, %v198_v59  ;;  %v272_v42 = vrot.slane %v216_v17, %v856_v30 }
  0xd0   :  { %v596_v22 = vpop.eup %595  ;;  %v172_v24 = vsel %vm171_vm9, %v843_v62, %v170_v3  ;;  %v203_v27 = vsel %vm201_vm11, %v202_v10, %v200_v50  ;;  %v248_v62 = vrot.slane %v212_v16, %v856_v30  ;;  %v268_v41 = vrot.slane %v215_v37, %v850_v26 }
  0xd1   :  { %v598_v34 = vpop.eup %597  ;;  %v175_v63 = vsel %vm173_vm12, %v174_v61, %v172_v24  ;;  %v205_v11 = vmul.f32 %v596_v22, %v847_v25  ;;  %v217_v23 = vadd.f32 %v203_v27, %v809_v31  ;;  %v456_v22 = vsub.s32 0, %v835_v55 }
  0xd2   :  { %v177_v38 = vmul.f32 %v598_v34, %v853_v29  ;;  %v213_v57 = vadd.f32 %v175_v63, %v815_v36  ;;  %v273_v30 = vsel %vm249_vm13, %v272_v42, %v268_v41 }
  0xd3   :  { %v207_v7 = vsel %vm206_vm14, %v847_v25, %v205_v11  ;;  %v277_v36 = vrot.slane %v217_v23, %v859_v33  ;;  %v250_v25 = vsel %vm249_vm13, %v248_v62, %v243_v46 }
  0xd4   :  { %v179_v31 = vsel %vm178_vm0, %v853_v29, %v177_v38  ;;  %v210_v43 = vsel %vm208_vm15, %v209_v40, %v207_v7  ;;  %v255_v51 = vrot.slane %v213_v57, %v859_v33  ;;  %v541_v33 = vld [vmem:[%s985_s2] ss:$0 sm:$0xff]  ;;  %s657_s2 = smov [#allocation5]  }
  0xd5   :  { %v182_v47 = vsel %vm180_vm1, %v181_v39, %v179_v31  ;;  %v218_v48 = vadd.f32 %v210_v43, %v823_v44  ;;  %v278_v26 = vsel %vm256_vm2, %v277_v36, %v273_v30 }
  0xd6   :  { %v214_v52 = vadd.f32 %v182_v47, %v829_v49  ;;  %v257_v54 = vsel %vm256_vm2, %v255_v51, %v250_v25  ;;  %v362_v49 = vld [vmem:[%s986_s3] sm:$0x3]  ;;  %s529_s3 = sshll.u32 %s657_s2, 4  ;;  %s530_s3 = int_to_ptr.vmem [resolvable:$true] %s529_s3 }
  0xd7   :  { %v282_v29 = vrot.slane %v218_v48, %v865_v35  ;;  %566 = vmatpush3.msk.msra.mxu1 %vm374_vm6, %v362_v49  ;;  %s625_s4 = scalar_lea.vmem %s530_s3, 2048  ;;  %p630_p9 = scmp.lt.s32.totalorder %s530_s3, %s530_s3 }
  0xd8   :  { %v262_v53 = vrot.slane %v214_v52, %v865_v35  ;;  %p626_p8 = scmp.ne.s32.totalorder %s530_s3, %s625_s4  ;;  %p631_p10 = scmp.lt.s32.totalorder %s625_s4, %s625_s4 }
  0xd9   :  { %v283_v32 = vsel %vm263_vm3, %v282_v29, %v278_v26 }
  0xda   :  { %v264_v44 = vsel %vm263_vm3, %v262_v53, %v257_v54  ;;  %p632_p11 = por %p631_p10, %p630_p9 }
  0xdb   :  { %v285_v56 = vsel %vm284_vm4, %v283_v32, %v264_v44 }
  0xdc   :  { %563 = vmatmul.mubr.msk.f32.vlgmr.msra.gmra.mrb[0].mxu0 %vm286_vm5, %v285_v56  ;;  %p633_p12 = pnand %p632_p11, %p626_p8 }
 0x1af   :  { %v355_v58 = vpop.f32.mrb[0].mxu0 }
 0x1b0   :  { %v356_v35 = vadd.f32 %v541_v33, %v355_v58  ;;  %v564_v59 = vpop.f32.mrb[1].mxu0 }
 0x1b2   :  { %vm359_vm7 = vcmp.ge.f32.partialorder %v356_v35, 0.0  ;;  %v360_v60 = vmul.f32 0.1, %v356_v35 }
 0x1b4   :  { %v361_v61 = vsel %vm359_vm7, %v356_v35, %v360_v60 }
 0x1b5   :  { %568 = vmatmul.mubr.msk.f32.vlgmr.msra.gmra.mrb[0].mxu1 %vm370_vm8, %v361_v61 }
 0x288   :  { %v444_v3 = vpop.f32.mrb[0].mxu1 }
 0x289   :  { %v445_v10 = vadd.f32 %v543_v45, %v444_v3  ;;  %v569_v50 = vpop.f32.mrb[1].mxu1 }
 0x28b   :  { %v546_v16 = vmul.f32 -1.442695, %v445_v10 }
 0x28d   :  { %599 = vpow2.f32 %v546_v16 }
 0x297   :  { %v600_v37 = vpop.eup %599 }
 0x298   :  { %v451_v17 = vadd.f32 1.0, %v600_v37 }
 0x29a   :  { %601 = vrcp.f32 %v451_v17 }
 0x2a4   :  { %v602_v24 = vpop.eup %601 }
 0x2a5   :  { %v457_v27 = vrot.slane %v602_v24, %v456_v22  ;;  %v476_v34 = vrot.slane %v602_v24, %v475_v28 }
 0x2a7   :  { %463 = vbcast.lane.b32.xlu1 %v457_v27, 264  ;;  %459 = vbcast.lane.b32.xlu0 %v457_v27, 256 }
 0x2ab   :  { %467 = vbcast.lane.b32.xlu1 %v457_v27, 272  ;;  %478 = vbcast.lane.b32.xlu0 %v476_v34, 256 }
 0x2af   :  { %471 = vbcast.lane.b32.xlu1 %v457_v27, 280  ;;  %486 = vbcast.lane.b32.xlu0 %v476_v34, 272 }
 0x2b3   :  { %482 = vbcast.lane.b32.xlu1 %v476_v34, 264 }
 0x2b7   :  { %490 = vbcast.lane.b32.xlu1 %v476_v34, 280 }
 0x319   :  { %v464_v63 = vpop.permute.xlu1 %463  ;;  %v460_v11 = vpop.permute.xlu0 %459 }
 0x31a   :  { %v494_v23 = vmul.f32 %v464_v63, %v719_v8  ;;  %v495_v38 = vmul.f32 %v464_v63, %v721_v9  ;;  %v492_v39 = vmul.f32 %v460_v11, %v707_v2  ;;  %v493_v40 = vmul.f32 %v460_v11, %v711_v4 }
 0x31c   :  { %510 = vst [vmem:[#allocation5 + $0x10] sm:$0xff] %v494_v23  ;;  %511 = vst [vmem:[#allocation5 + $0x18] sm:$0xff] %v495_v38 }
 0x31d   :  { %508 = vst [vmem:[#allocation5] sm:$0xff] %v492_v39  ;;  %509 = vst [vmem:[#allocation5 + $0x8] sm:$0xff] %v493_v40  ;;  %v468_v55 = vpop.permute.xlu1 %467  ;;  %v479_v57 = vpop.permute.xlu0 %478 }
 0x31e   :  { %v496_v7 = vmul.f32 %v468_v55, %v731_v14  ;;  %v497_v62 = vmul.f32 %v468_v55, %v733_v15  ;;  %v500_v41 = vmul.f32 %v479_v57, %v703_v0  ;;  %v501_v8 = vmul.f32 %v479_v57, %v705_v1 }
 0x320   :  { %512 = vst [vmem:[#allocation5 + $0x20] sm:$0xff] %v496_v7  ;;  %513 = vst [vmem:[#allocation5 + $0x28] sm:$0xff] %v497_v62 }
 0x321   :  { %516 = vst [vmem:[#allocation5 + $0x40] sm:$0xff] %v500_v41  ;;  %517 = vst [vmem:[#allocation5 + $0x48] sm:$0xff] %v501_v8  ;;  %v472_v2 = vpop.permute.xlu1 %471  ;;  %v487_v4 = vpop.permute.xlu0 %486 }
 0x322   :  { %v498_v9 = vmul.f32 %v472_v2, %v743_v20  ;;  %v499_v42 = vmul.f32 %v472_v2, %v745_v21  ;;  %v504_v31 = vmul.f32 %v487_v4, %v727_v12  ;;  %v505_v14 = vmul.f32 %v487_v4, %v729_v13 }
 0x324   :  { %514 = vst [vmem:[#allocation5 + $0x30] sm:$0xff] %v498_v9  ;;  %515 = vst [vmem:[#allocation5 + $0x38] sm:$0xff] %v499_v42 }
 0x325   :  { %520 = vst [vmem:[#allocation5 + $0x60] sm:$0xff] %v504_v31  ;;  %521 = vst [vmem:[#allocation5 + $0x68] sm:$0xff] %v505_v14  ;;  %v483_v0 = vpop.permute.xlu1 %482 }
 0x326   :  { %v502_v1 = vmul.f32 %v483_v0, %v713_v5  ;;  %v503_v15 = vmul.f32 %v483_v0, %v715_v6 }
 0x328   :  { %518 = vst [vmem:[#allocation5 + $0x50] sm:$0xff] %v502_v1  ;;  %519 = vst [vmem:[#allocation5 + $0x58] sm:$0xff] %v503_v15 }
 0x329   :  { %v491_v20 = vpop.permute.xlu1 %490 }
 0x32a   :  { %v506_v21 = vmul.f32 %v491_v20, %v739_v18  ;;  %v507_v12 = vmul.f32 %v491_v20, %v741_v19 }
 0x32c   :  { %522 = vst [vmem:[#allocation5 + $0x70] sm:$0xff] %v506_v21  ;;  %523 = vst [vmem:[#allocation5 + $0x78] sm:$0xff] %v507_v12 }
 0x32d   :  { %636 = shalt.err (!%p633_p12)
}
 0x32e   :  { %s637_s21 = scalar_lea.hbm %s988_s5, 2048 }
 0x32f   :  { %p638_p13 = scmp.ne.s32.totalorder %s988_s5, %s637_s21  ;;  %p641_p0 = scmp.lt.u32.totalorder %s637_s21, %s988_s5 }
 0x331   :  { %p643_p1 = pnand %p641_p0, %p638_p13 }
 0x333   :  { %646 = shalt.err (!%p643_p1)
}
 0x334   :  { %535 = dma.vmem_to_hbm [thread:$0]  %s530_s3, 2048, %s988_s5, [#allocation4], %s652_s28, %s652_s28, %s653_s29  }
 0x335   :  { %649 = dma.done.wait [#allocation4], 2048  }
 0x336   :  { %650 = vsyncadd [#allocation4], 4294965248 }
 0x337   :  { %539 = vsyncpa [#allocation3], 1 }
 0x338   :  { %540 = vsyncpa [#allocation4], 1 }

</bundles_post_ra>
